<compile_context>
chip_gen: v7x
topology: tpu7x:2x2x1
jax: 0.10.0
libtpu: 0.0.40
codegen_flags: <defaults>
</compile_context>

<pallas_src>
import functools

import jax
import jax.numpy as jnp
from jax.experimental import pallas as pl
from jax.experimental.pallas import tpu as pltpu


def _rnn_cell_kernel(z_ref, w_ref, b_ref, out_ref, acc_ref, *, nonlinearity):
    # z_ref: (tm, tk)  w_ref: (tk, tn)  b_ref: (1, tn)
    # out_ref: (tm, tn)  acc_ref: f32 (tm, tn) scratch, resident across k.
    k = pl.program_id(2)

    @pl.when(k == 0)
    def _():
        acc_ref[...] = jnp.zeros_like(acc_ref)

    acc_ref[...] += jnp.dot(z_ref[...], w_ref[...],
                            preferred_element_type=jnp.float32)

    @pl.when(k == pl.num_programs(2) - 1)
    def _():
        hy = acc_ref[...] + b_ref[...].astype(jnp.float32)
        if nonlinearity == "tanh":
            hy = jnp.tanh(hy)          # EUP; f32 epilogue on all chips
        else:
            hy = jnp.maximum(hy, 0.0)
        out_ref[...] = hy.astype(out_ref.dtype)


def prepare_rnn_cell_params(wx, bx, wh, bh):
    """One-time (outside the hot path) fusion of the RNNCell parameters.

    wx: (H, In)  bx: (H,)  wh: (H, H)  bh: (H,)
    returns  W: (In + H, H)   b: (1, H)
    """
    w = jnp.concatenate([wx.T, wh.T], axis=0)
    b = (bx + bh).reshape(1, -1)
    return w, b


def _choose_block(dim, target, align):
    """Largest block <= target that is a multiple of `align` and divides `dim`
    exactly; falls back to the full dim (always a legal block shape)."""
    if dim <= target:
        return dim
    t = (target // align) * align
    while t >= align:
        if dim % t == 0:
            return t
        t -= align
    return dim


def rnn_cell_forward(x, hx, w_fused, b_fused, *, nonlinearity="tanh",
                     compute_dtype=None):
    """Pallas RNNCell forward.

    x:  (B, In)          w_fused: (In + H, H)   (from prepare_rnn_cell_params)
    hx: (B, H) or None   b_fused: (1, H)
    returns hy: (B, H)

    compute_dtype: optional dtype (e.g. jnp.bfloat16) for the MXU operands;
    accumulation, bias add and the nonlinearity stay in f32.
    """
    if nonlinearity not in ("tanh", "relu"):
        raise ValueError("Invalid nonlinearity selected for RNN.")

    B, In = x.shape
    H = w_fused.shape[1]

    if hx is None:
        # hx defaults to zeros: the h2h matmul contributes nothing beyond the
        # (already folded) bias, so skip the H x H weight entirely.
        z = x
        w = w_fused[:In]
    else:
        z = jnp.concatenate([x, hx], axis=1)       # (B, In + H)
        w = w_fused

    if compute_dtype is not None:
        z = z.astype(compute_dtype)
        w = w.astype(compute_dtype)

    K = z.shape[1]

    # Tile sizes: sublane-aligned batch tiles, lane-dense (multiple of 128 or
    # full-dim) output / contraction tiles. For the small demo these collapse
    # to full-array blocks (grid (1,1,1)).
    tm = _choose_block(B, 256, 8)
    tn = _choose_block(H, 256, 128)
    tk = _choose_block(K, 512, 128)
    grid = (B // tm, H // tn, K // tk)

    in_bytes = jnp.dtype(z.dtype).itemsize
    out_bytes = jnp.dtype(x.dtype).itemsize
    b_bytes = jnp.dtype(b_fused.dtype).itemsize

    # Explicit VMEM budget from the chosen tiles (double-buffered inputs and
    # outputs + f32 accumulator), with 2x margin; safe on v7x's 64 MiB VMEM.
    vmem_need = (2 * (tm * tk + tk * tn) * in_bytes
                 + 2 * tn * b_bytes
                 + 2 * tm * tn * out_bytes
                 + tm * tn * 4)
    vmem_limit = int(min(max(2 * vmem_need, 16 * 1024 * 1024), 64 * 1024 * 1024))

    cost = pl.CostEstimate(
        flops=2 * B * K * H,
        transcendentals=B * H if nonlinearity == "tanh" else 0,
        bytes_accessed=(B * K * in_bytes + K * H * in_bytes
                        + H * b_bytes + B * H * out_bytes),
    )

    kernel = functools.partial(_rnn_cell_kernel, nonlinearity=nonlinearity)

    return pl.pallas_call(
        kernel,
        out_shape=jax.ShapeDtypeStruct((B, H), x.dtype),
        grid_spec=pltpu.PrefetchScalarGridSpec(
            num_scalar_prefetch=0,
            grid=grid,
            in_specs=[
                pl.BlockSpec((tm, tk), lambda i, j, k: (i, k)),   # z
                pl.BlockSpec((tk, tn), lambda i, j, k: (k, j)),   # W
                pl.BlockSpec((1, tn), lambda i, j, k: (0, j)),    # b
            ],
            out_specs=pl.BlockSpec((tm, tn), lambda i, j, k: (i, j)),
            scratch_shapes=[pltpu.VMEM((tm, tn), jnp.float32)],
        ),
        compiler_params=pltpu.CompilerParams(
            dimension_semantics=("parallel", "parallel", "arbitrary"),
            vmem_limit_bytes=vmem_limit,
        ),
        cost_estimate=cost,
    )(z, w, b_fused)


def init_rnn_cell_params(key, input_size, hidden_size, dtype=jnp.float32):
    """Deterministic init matching PyTorch reset_parameters: U(-std, std)."""
    std = 1.0 / jnp.sqrt(jnp.asarray(hidden_size, dtype=jnp.float32))
    k1, k2, k3, k4 = jax.random.split(key, 4)
    wx = jax.random.uniform(k1, (hidden_size, input_size), dtype, -std, std)
    bx = jax.random.uniform(k2, (hidden_size,), dtype, -std, std)
    wh = jax.random.uniform(k3, (hidden_size, hidden_size), dtype, -std, std)
    bh = jax.random.uniform(k4, (hidden_size,), dtype, -std, std)
    return wx, bx, wh, bh


if __name__ == "__main__":
    key = jax.random.PRNGKey(0)
    k_x, k_h, k_p = jax.random.split(key, 3)

    batch, input_size, hidden_size = 8, 16, 32
    x = jax.random.normal(k_x, (batch, input_size), jnp.float32)
    hx = jax.random.normal(k_h, (batch, hidden_size), jnp.float32)
    wx, bx, wh, bh = init_rnn_cell_params(k_p, input_size, hidden_size)

    # Fuse/transpose the weights once, outside the per-step hot path.
    w_fused, b_fused = prepare_rnn_cell_params(wx, bx, wh, bh)

    # tanh path
    hy = jax.block_until_ready(
        rnn_cell_forward(x, hx, w_fused, b_fused, nonlinearity="tanh"))
    ref = jnp.tanh(x @ wx.T + bx + hx @ wh.T + bh)
    assert hy.shape == (batch, hidden_size)
    assert jnp.allclose(hy, ref, atol=1e-5, rtol=1e-5)

    # relu path
    hy_r = jax.block_until_ready(
        rnn_cell_forward(x, hx, w_fused, b_fused, nonlinearity="relu"))
    ref_r = jnp.maximum(x @ wx.T + bx + hx @ wh.T + bh, 0.0)
    assert jnp.allclose(hy_r, ref_r, atol=1e-5, rtol=1e-5)

    # hx=None fast path (skips the HxH weight entirely).
    hy0 = jax.block_until_ready(
        rnn_cell_forward(x, None, w_fused, b_fused, nonlinearity="tanh"))
    ref0 = jnp.tanh(x @ wx.T + bx + bh)
    assert jnp.allclose(hy0, ref0, atol=1e-5, rtol=1e-5)

    print("KERNEL_OK")
</pallas_src>

<mosaic_0001>
module attributes {stable_mosaic.version = 11 : i64} {
  func.func @_rnn_cell_kernel(%arg0: i32, %arg1: i32, %arg2: i32, %arg3: memref<8x48xf32, #tpu.memory_space<vmem>>, %arg4: memref<48x32xf32, #tpu.memory_space<vmem>>, %arg5: memref<1x32xf32, #tpu.memory_space<vmem>>, %arg6: memref<8x32xf32, #tpu.memory_space<vmem>>, %arg7: memref<8x32xf32, #tpu.memory_space<vmem>>) attributes {dimension_semantics = [#tpu.dimension_semantics<parallel>, #tpu.dimension_semantics<parallel>, #tpu.dimension_semantics<arbitrary>], iteration_bounds = array<i64: 1, 1, 1>, scalar_prefetch = 0 : i64, scratch_operands = 1 : i64, tpu.core_type = #tpu.core_type<tc>, window_params = [{transform_indices = @transform_0, window_bounds = array<i64: 8, 48>}, {transform_indices = @transform_1, window_bounds = array<i64: 48, 32>}, {transform_indices = @transform_2, window_bounds = array<i64: 1, 32>}, {transform_indices = @transform_3, window_bounds = array<i64: 8, 32>}]} {
    %c0_i32 = arith.constant 0 : i32
    %0 = arith.cmpi eq, %arg2, %c0_i32 : i32
    %1 = arith.extui %0 : i1 to i32
    %c0_i32_0 = arith.constant 0 : i32
    %2 = arith.cmpi ne, %1, %c0_i32_0 : i32
    scf.if %2 {
      %cst_10 = arith.constant 0.000000e+00 : f32
      %12 = vector.broadcast %cst_10 : f32 to vector<8x32xf32>
      %c0_11 = arith.constant 0 : index
      %c0_12 = arith.constant 0 : index
      %13 = vector.load %arg7[%c0_11, %c0_12] : memref<8x32xf32, #tpu.memory_space<vmem>>, vector<8x32xf32>
      tpu.vector_store %arg7[%c0_11, %c0_12], %12 {strides = array<i32>} : memref<8x32xf32, #tpu.memory_space<vmem>>, vector<8x32xf32>,
    } else {
    }
    %c0 = arith.constant 0 : index
    %c0_1 = arith.constant 0 : index
    %3 = vector.load %arg7[%c0, %c0_1] : memref<8x32xf32, #tpu.memory_space<vmem>>, vector<8x32xf32>
    %c0_2 = arith.constant 0 : index
    %c0_3 = arith.constant 0 : index
    %4 = vector.load %arg3[%c0_2, %c0_3] : memref<8x48xf32, #tpu.memory_space<vmem>>, vector<8x48xf32>
    %c0_4 = arith.constant 0 : index
    %c0_5 = arith.constant 0 : index
    %5 = vector.load %arg4[%c0_4, %c0_5] : memref<48x32xf32, #tpu.memory_space<vmem>>, vector<48x32xf32>
    %cst = arith.constant dense<0.000000e+00> : vector<8x32xf32>
    %6 = tpu.matmul %4, %5, %cst {dimension_numbers = #tpu.dot_dimension_numbers<[1], [0], [0], [1], [0, 0, 1, 1], [], []>} : vector<8x48xf32>, vector<48x32xf32>, vector<8x32xf32> -> vector<8x32xf32>
    %7 = arith.addf %3, %6 : vector<8x32xf32>
    %c0_6 = arith.constant 0 : index
    %c0_7 = arith.constant 0 : index
    %8 = vector.load %arg7[%c0_6, %c0_7] : memref<8x32xf32, #tpu.memory_space<vmem>>, vector<8x32xf32>
    tpu.vector_store %arg7[%c0_6, %c0_7], %7 {strides = array<i32>} : memref<8x32xf32, #tpu.memory_space<vmem>>, vector<8x32xf32>,
    %c0_i32_8 = arith.constant 0 : i32
    %9 = arith.cmpi eq, %arg2, %c0_i32_8 : i32
    %10 = arith.extui %9 : i1 to i32
    %c0_i32_9 = arith.constant 0 : i32
    %11 = arith.cmpi ne, %10, %c0_i32_9 : i32
    scf.if %11 {
      %c0_10 = arith.constant 0 : index
      %c0_11 = arith.constant 0 : index
      %12 = vector.load %arg7[%c0_10, %c0_11] : memref<8x32xf32, #tpu.memory_space<vmem>>, vector<8x32xf32>
      %c0_12 = arith.constant 0 : index
      %c0_13 = arith.constant 0 : index
      %13 = vector.load %arg5[%c0_12, %c0_13] : memref<1x32xf32, #tpu.memory_space<vmem>>, vector<1x32xf32>
      %14 = vector.broadcast %13 : vector<1x32xf32> to vector<8x32xf32>
      %15 = arith.addf %12, %14 : vector<8x32xf32>
      %16 = math.tanh %15 : vector<8x32xf32>
      %c0_14 = arith.constant 0 : index
      %c0_15 = arith.constant 0 : index
      %17 = vector.load %arg6[%c0_14, %c0_15] : memref<8x32xf32, #tpu.memory_space<vmem>>, vector<8x32xf32>
      tpu.vector_store %arg6[%c0_14, %c0_15], %16 {strides = array<i32>} : memref<8x32xf32, #tpu.memory_space<vmem>>, vector<8x32xf32>,
    } else {
    }
    return
  }
  func.func @transform_0(%arg0: i32, %arg1: i32, %arg2: i32) -> (i32, i32) {
    %c0_i32 = arith.constant 0 : i32
    return %arg0, %arg2 : i32, i32
  }
  func.func @transform_1(%arg0: i32, %arg1: i32, %arg2: i32) -> (i32, i32) {
    %c0_i32 = arith.constant 0 : i32
    return %arg2, %arg1 : i32, i32
  }
  func.func @transform_2(%arg0: i32, %arg1: i32, %arg2: i32) -> (i32, i32) {
    %c0_i32 = arith.constant 0 : i32
    %c0_i32_0 = arith.constant 0 : i32
    return %c0_i32, %arg1 : i32, i32
  }
  func.func @transform_3(%arg0: i32, %arg1: i32, %arg2: i32) -> (i32, i32) {
    %c0_i32 = arith.constant 0 : i32
    return %arg0, %arg1 : i32, i32
  }
}

</mosaic_0001>

<bundles_post_ra>
// kernel: tpu_custom_call.1
= control target key start
LH: loop header
LB: loop body
LE: loop exit
PB: predicated region body
PF: predicated region fallthrough
CT: control target
= control target key end

     0   :  { %vm19_vm0 = vcmask 261120   ;;  %v197_v3 = vmov 0.0|0.0   ;;  %v198_v6 = vmov 0.0   ;;  %vm199_vm1 = vmmov 0   ;;  %s260_s0 = inlined_call_operand.vmem [shape: f32[8,48], index: 0, kind: input, shape index: {}]   ;;  %s261_s1 = inlined_call_operand.vmem [shape: f32[48,32], index: 1, kind: input, shape index: {}]   ;;  %s262_s2 = inlined_call_operand.vmem [shape: f32[1,32], index: 2, kind: input, shape index: {}]   ;;  %s263_s3 = inlined_call_operand.hbm [shape: f32[8,32], index: 3, kind: output, shape index: {}]  }
   0x1   :  { %v23_v0 = vld [vmem:[%s261_s1] sm:$0xff]  ;;  %v24_v1 = vld [vmem:[%s261_s1 + $0x8] sm:$0xff]  ;;  %v25_v2 = vld [vmem:[%s261_s1 + $0x10] sm:$0xff]  ;;  %158 = vmatprep.subr.bf16.mxu0 %v197_v3  ;;  %20 = vst.msk [vmem:[#allocation2] sm:$0xff] %vm19_vm0, %v198_v6  ;;  %155 = vmatprep.mubr.msk.f32.mxu0 %vm199_vm1, %v198_v6 }
   0x2   :  { %v159_v4 = vpack.c.bf16 %v24_v1, %v23_v0  ;;  %v26_v5 = vld [vmem:[%s261_s1 + $0x18] sm:$0xff] }
   0x3   :  { %8 = vsyncpa [#allocation4], 0  ;;  %v162_v7 = vpack.c.bf16 %v26_v5, %v25_v2  ;;  %v27_v8 = vld [vmem:[%s261_s1 + $0x20] sm:$0xff]  ;;  %v28_v9 = vld [vmem:[%s261_s1 + $0x28] sm:$0xff]  ;;  %vm29_vm2 = vcmask 392192   ;;  %s200_s1 = smov [#allocation3]  }
   0x4   :  { %160 = vmatpush3.bf16.msra.mxu0 %v159_v4  ;;  %v165_v10 = vpack.c.bf16 %v28_v9, %v27_v8  ;;  %v22_v11 = vld [vmem:[%s260_s0] sm:$0xff]  ;;  %s126_s28 = sshll.u32 %s200_s1, 4  ;;  %s127_s28 = int_to_ptr.vmem [resolvable:$true] %s126_s28 }
   0x5   :  { %161 = vmatprep.subr.bf16.mxu0 %v197_v3  ;;  %v135_v16 = vld [vmem:[%s262_s2] ss:$0 sm:$0xff]  ;;  %s173_s0 = scalar_lea.vmem %s127_s28, 128  ;;  %p178_p1 = scmp.lt.s32.totalorder %s127_s28, %s127_s28 }
   0x6   :  { %p174_p0 = scmp.ne.s32.totalorder %s127_s28, %s173_s0  ;;  %p179_p2 = scmp.lt.s32.totalorder %s173_s0, %s173_s0 }
   0x8   :  { %163 = vmatpush3.bf16.msra.mxu0 %v162_v7  ;;  %v21_v12 = vld [vmem:[#allocation2] sm:$0xff]  ;;  %p180_p3 = por %p179_p2, %p178_p1 }
   0x9   :  { %164 = vmatprep.subr.bf16.mxu0 %v197_v3 }
   0xa   :  { %p181_p4 = pnand %p180_p3, %p174_p0 }
   0xc   :  { %166 = vmatpush3.bf16.msra.mxu0 %v165_v10 }
   0xf   :  { %156 = vmatmul.mubr.msk.f32.vlgmr.msra.gmra.mrb[0].mxu0 %vm29_vm2, %v22_v11 }
  0xe2   :  { %v99_v13 = vpop.f32.mrb[0].mxu0 }
  0xe3   :  { %v103_v14 = vadd.f32 %v99_v13, %v21_v12  ;;  %v157_v15 = vpop.f32.mrb[1].mxu0 }
  0xe5   :  { %105 = vst.msk [vmem:[#allocation2] sm:$0xff] %vm19_vm0, %v103_v14 }
  0xec   :  { %v109_v17 = vld [vmem:[#allocation2] sm:$0xff] }
  0xed   :  { %v117_v18 = vadd.f32 %v135_v16, %v109_v17 }
  0xef   :  { %171 = vtanh.f32 %v117_v18 }
  0xf9   :  { %v172_v19 = vpop.eup %171 }
  0xfa   :  { %119 = vst.msk [vmem:[#allocation3] sm:$0xff] %vm19_vm0, %v172_v19 }
  0xfb   :  { %184 = shalt.err (!%p181_p4)
}
  0xfc   :  { %s185_s2 = scalar_lea.hbm %s263_s3, 128 }
  0xfd   :  { %p186_p5 = scmp.ne.s32.totalorder %s263_s3, %s185_s2  ;;  %p189_p6 = scmp.lt.u32.totalorder %s185_s2, %s263_s3 }
  0xff   :  { %p191_p7 = pnand %p189_p6, %p186_p5 }
 0x101   :  { %194 = shalt.err (!%p191_p7)
}
 0x102   :  { %129 = dma.vmem_to_hbm [thread:$0]  %s127_s28, 128, %s263_s3, [#allocation4]  }
 0x103   :  { %195 = dma.done.wait [#allocation4], 128  }
 0x104   :  { %196 = vsyncadd [#allocation4], 4294967168 }
 0x105   :  { %133 = vsyncpa [#allocation4], 1 }

</bundles_post_ra>
